<compile_context>
chip_gen: v5e
topology: v5e:2x2
jax: 0.10.0
libtpu: 0.0.40
codegen_flags: <defaults>
</compile_context>

<pallas_src>
import functools

import jax
import jax.numpy as jnp
from jax.experimental import pallas as pl
from jax.experimental.pallas import tpu as pltpu

EPS = 1e-12


def bert_self_output_kernel(x_ref, res_ref, w_ref, b_ref, g_ref, beta_ref, o_ref,
                            *, precision):
    # x_ref, res_ref, o_ref: (TM, H)   w_ref: (H_in, H_out) pre-transposed
    # b_ref / g_ref / beta_ref: (1, H)
    x = x_ref[...]

    # Dense: y = x @ W_t + b.  W is already (H_in, H_out) so this is a plain
    # lane-contracting matmul on the MXU; f32 accumulation.
    y = jnp.dot(x, w_ref[...], preferred_element_type=jnp.float32, precision=precision)
    y = y + b_ref[...].astype(jnp.float32)

    # Dropout: eval-mode identity.
    # TODO(synk): training-mode dropout (inverted mask via pltpu.prng_random_bits) not emitted.

    # Residual add (f32)
    y = y + res_ref[...].astype(jnp.float32)

    # LayerNorm over last dim (biased variance), eps=1e-12 (f32 math)
    mean = jnp.mean(y, axis=-1, keepdims=True)
    centered = y - mean
    var = jnp.mean(centered * centered, axis=-1, keepdims=True)
    inv = jax.lax.rsqrt(var + EPS)
    out = centered * inv * g_ref[...].astype(jnp.float32) + beta_ref[...].astype(jnp.float32)

    # Note: on a partial last row-tile the padded rows hold undefined data; LayerNorm
    # is strictly per-row and out-of-bounds rows are masked on the store, so valid
    # output is unaffected.
    o_ref[...] = out.astype(o_ref.dtype)


def bert_self_output(hidden_states, input_tensor, weight, bias, gamma, beta,
                     *, block_m: int = 512, mxu_dtype=jnp.bfloat16, precision=None):
    """hidden_states, input_tensor: (B, S, H); weight: (H_out, H_in) torch-style.

    block_m:   row-tile size (multiple of 8; default 512 = multiple of 256/128 for
               every MXU generation).  Auto-shrunk if the VMEM budget demands it.
    mxu_dtype: dtype fed to the MXU (default bf16; accumulation + LayerNorm stay
               f32; output keeps the input dtype).  None => use the input dtype.
    precision: optional lax.Precision for the matmul (e.g. HIGHEST for bit-tight
               f32); default None = DEFAULT MXU precision.
    """
    B, S, H = hidden_states.shape
    M = B * S
    out_dtype = hidden_states.dtype

    x2 = hidden_states.reshape(M, H)
    r2 = input_tensor.reshape(M, H)
    b2 = bias.reshape(1, H)
    g2 = gamma.reshape(1, H)
    be2 = beta.reshape(1, H)

    # One-time transpose (amortized over the whole grid): torch (H_out, H_in) -> (H_in, H_out).
    w_t = weight.T
    if mxu_dtype is not None:
        x2 = x2.astype(mxu_dtype)
        w_t = w_t.astype(mxu_dtype)

    # ---- row-tile selection -------------------------------------------------
    tm = min(block_m, M)
    if tm < M:
        tm = max(8, (tm // 8) * 8)   # (8,128) divisibility when not the full extent

    act_isz = jnp.dtype(x2.dtype).itemsize
    res_isz = jnp.dtype(r2.dtype).itemsize
    out_isz = jnp.dtype(out_dtype).itemsize
    w_isz = jnp.dtype(w_t.dtype).itemsize

    def vmem_needed(tm_):
        return (2 * tm_ * H * (act_isz + res_isz + out_isz)   # double-buffered activation streams
                + 2 * H * H * w_isz                           # resident weight (double-buffered alloc)
                + 2 * 3 * H * 4                               # resident bias/gamma/beta
                + 4 * tm_ * H * 4)                            # f32 intermediates headroom

    # Per-generation VMEM cap (v5e/v6e: 128 MiB, v7x: 64 MiB per TensorCore).
    try:
        phys_vmem = int(pltpu.get_tpu_info().vmem_capacity_bytes)
    except Exception:
        phys_vmem = 64 << 20
    vmem_cap = max(int(0.7 * phys_vmem), 16 << 20)

    while vmem_needed(tm) > vmem_cap and tm > 256:
        tm = max(256, tm // 2)
    if tm < M:
        tm = max(8, (tm // 8) * 8)

    grid_m = pl.cdiv(M, tm)
    vmem_limit = int(min(max(vmem_needed(tm) + (2 << 20), 16 << 20), vmem_cap))

    cost = pl.CostEstimate(
        flops=2 * M * H * H,
        transcendentals=M,  # one rsqrt per row
        bytes_accessed=(M * H * (act_isz + res_isz + out_isz)
                        + H * H * w_isz + 3 * H * 4),
    )

    kernel = functools.partial(bert_self_output_kernel, precision=precision)

    out2 = pl.pallas_call(
        kernel,
        out_shape=jax.ShapeDtypeStruct((M, H), out_dtype),
        grid_spec=pl.GridSpec(
            grid=(grid_m,),
            in_specs=[
                pl.BlockSpec((tm, H), lambda i: (i, 0)),   # x tile (pipelined)
                pl.BlockSpec((tm, H), lambda i: (i, 0)),   # residual tile (pipelined)
                pl.BlockSpec((H, H), lambda i: (0, 0)),    # W (pre-transposed): resident
                pl.BlockSpec((1, H), lambda i: (0, 0)),    # bias: resident
                pl.BlockSpec((1, H), lambda i: (0, 0)),    # gamma: resident
                pl.BlockSpec((1, H), lambda i: (0, 0)),    # beta: resident
            ],
            out_specs=pl.BlockSpec((tm, H), lambda i: (i, 0)),
        ),
        compiler_params=pltpu.CompilerParams(
            dimension_semantics=("parallel",),   # independent row tiles -> megacore on v7x
            vmem_limit_bytes=vmem_limit,
        ),
        cost_estimate=cost,
    )(x2, r2, w_t, b2, g2, be2)

    return out2.reshape(B, S, H)


def _reference(hidden_states, input_tensor, weight, bias, gamma, beta):
    y = hidden_states @ weight.T + bias
    y = y + input_tensor
    mean = jnp.mean(y, axis=-1, keepdims=True)
    var = jnp.mean((y - mean) ** 2, axis=-1, keepdims=True)
    return gamma * (y - mean) / jnp.sqrt(var + EPS) + beta


if __name__ == "__main__":
    key = jax.random.PRNGKey(0)

    # --- Test 1: small module-consistent shape (single tile path) ---
    B, S, H = 2, 8, 32
    k1, k2, k3, k4 = jax.random.split(key, 4)
    hidden_states = jax.random.normal(k1, (B, S, H), dtype=jnp.float32)
    input_tensor = jax.random.normal(k2, (B, S, H), dtype=jnp.float32)
    weight = jax.random.normal(k3, (H, H), dtype=jnp.float32) * (1.0 / jnp.sqrt(H))
    bias = jax.random.normal(k4, (H,), dtype=jnp.float32) * 0.01
    gamma = jnp.ones((H,), dtype=jnp.float32)
    beta = jnp.zeros((H,), dtype=jnp.float32)

    ref = _reference(hidden_states, input_tensor, weight, bias, gamma, beta)

    # Default production path: bf16 on the MXU, f32 epilogue, f32 output.
    out_bf16 = bert_self_output(hidden_states, input_tensor, weight, bias, gamma, beta)
    out_bf16 = jax.block_until_ready(out_bf16)
    assert out_bf16.shape == (B, S, H)
    assert out_bf16.dtype == jnp.float32
    assert jnp.allclose(out_bf16, ref, atol=3e-2, rtol=3e-2), "mismatch vs reference (bf16 MXU, small)"

    # All-f32 path (tight check).
    out_f32 = bert_self_output(hidden_states, input_tensor, weight, bias, gamma, beta,
                               mxu_dtype=None)
    out_f32 = jax.block_until_ready(out_f32)
    assert jnp.allclose(out_f32, ref, atol=1e-4, rtol=1e-4), "mismatch vs reference (f32, small)"

    # --- Test 2: exercise the tiled grid (multiple row tiles + partial tile) ---
    B2, S2, H2 = 2, 128, 128
    k5, k6, k7, k8 = jax.random.split(jax.random.PRNGKey(1), 4)
    hs2 = jax.random.normal(k5, (B2, S2, H2), dtype=jnp.float32)
    it2 = jax.random.normal(k6, (B2, S2, H2), dtype=jnp.float32)
    w2 = jax.random.normal(k7, (H2, H2), dtype=jnp.float32) * (1.0 / jnp.sqrt(H2))
    bz2 = jax.random.normal(k8, (H2,), dtype=jnp.float32) * 0.01
    g2 = jnp.ones((H2,), dtype=jnp.float32)
    be2 = jnp.zeros((H2,), dtype=jnp.float32)

    ref2 = _reference(hs2, it2, w2, bz2, g2, be2)

    # Default bf16 path, default block_m (single 256-row tile here).
    out2_bf16 = bert_self_output(hs2, it2, w2, bz2, g2, be2)
    out2_bf16 = jax.block_until_ready(out2_bf16)
    assert out2_bf16.shape == (B2, S2, H2)
    assert jnp.allclose(out2_bf16, ref2, atol=3e-2, rtol=3e-2), "mismatch vs reference (bf16 MXU, tiled shape)"

    # f32 path with a multi-tile grid (grid=3, last tile partial).
    out2_f32 = bert_self_output(hs2, it2, w2, bz2, g2, be2, mxu_dtype=None, block_m=96)
    out2_f32 = jax.block_until_ready(out2_f32)
    assert jnp.allclose(out2_f32, ref2, atol=1e-4, rtol=1e-4), "mismatch vs reference (f32, tiled grid)"

    print("KERNEL_OK")
</pallas_src>

<mosaic_0001>
module attributes {stable_mosaic.version = 11 : i64} {
  func.func @bert_self_output_kernel(%arg0: i32, %arg1: memref<16x32xbf16, #tpu.memory_space<vmem>>, %arg2: memref<16x32xf32, #tpu.memory_space<vmem>>, %arg3: memref<32x32xbf16, #tpu.memory_space<vmem>>, %arg4: memref<1x32xf32, #tpu.memory_space<vmem>>, %arg5: memref<1x32xf32, #tpu.memory_space<vmem>>, %arg6: memref<1x32xf32, #tpu.memory_space<vmem>>, %arg7: memref<16x32xf32, #tpu.memory_space<vmem>>) attributes {dimension_semantics = [#tpu.dimension_semantics<parallel>], iteration_bounds = array<i64: 1>, scalar_prefetch = 0 : i64, scratch_operands = 0 : i64, tpu.core_type = #tpu.core_type<tc>, window_params = [{transform_indices = @transform_0, window_bounds = array<i64: 16, 32>}, {transform_indices = @transform_1, window_bounds = array<i64: 16, 32>}, {pipeline_mode = #tpu.pipeline_mode<synchronous>, transform_indices = @transform_2, window_bounds = array<i64: 32, 32>}, {pipeline_mode = #tpu.pipeline_mode<synchronous>, transform_indices = @transform_3, window_bounds = array<i64: 1, 32>}, {pipeline_mode = #tpu.pipeline_mode<synchronous>, transform_indices = @transform_4, window_bounds = array<i64: 1, 32>}, {pipeline_mode = #tpu.pipeline_mode<synchronous>, transform_indices = @transform_5, window_bounds = array<i64: 1, 32>}, {transform_indices = @transform_6, window_bounds = array<i64: 16, 32>}]} {
    %c0 = arith.constant 0 : index
    %c0_0 = arith.constant 0 : index
    %0 = vector.load %arg1[%c0, %c0_0] : memref<16x32xbf16, #tpu.memory_space<vmem>>, vector<16x32xbf16>
    %c0_1 = arith.constant 0 : index
    %c0_2 = arith.constant 0 : index
    %1 = vector.load %arg3[%c0_1, %c0_2] : memref<32x32xbf16, #tpu.memory_space<vmem>>, vector<32x32xbf16>
    %cst = arith.constant dense<0.000000e+00> : vector<16x32xf32>
    %2 = tpu.matmul %0, %1, %cst {dimension_numbers = #tpu.dot_dimension_numbers<[1], [0], [0], [1], [0, 0, 1, 1], [], []>} : vector<16x32xbf16>, vector<32x32xbf16>, vector<16x32xf32> -> vector<16x32xf32>
    %c0_3 = arith.constant 0 : index
    %c0_4 = arith.constant 0 : index
    %3 = vector.load %arg4[%c0_3, %c0_4] : memref<1x32xf32, #tpu.memory_space<vmem>>, vector<1x32xf32>
    %4 = vector.broadcast %3 : vector<1x32xf32> to vector<16x32xf32>
    %5 = arith.addf %2, %4 : vector<16x32xf32>
    %c0_5 = arith.constant 0 : index
    %c0_6 = arith.constant 0 : index
    %6 = vector.load %arg2[%c0_5, %c0_6] : memref<16x32xf32, #tpu.memory_space<vmem>>, vector<16x32xf32>
    %7 = arith.addf %5, %6 : vector<16x32xf32>
    %cst_7 = arith.constant dense<0.000000e+00> : vector<16xf32>
    %8 = vector.multi_reduction <add>, %7, %cst_7 [1] : vector<16x32xf32> to vector<16xf32>
    %9 = vector.shape_cast %8 : vector<16xf32> to vector<16x1xf32>
    %cst_8 = arith.constant 3.200000e+01 : f32
    %10 = vector.broadcast %cst_8 : f32 to vector<16x1xf32>
    %11 = arith.divf %9, %10 : vector<16x1xf32>
    %12 = vector.broadcast %11 : vector<16x1xf32> to vector<16x32xf32>
    %13 = arith.subf %7, %12 : vector<16x32xf32>
    %14 = arith.mulf %13, %13 : vector<16x32xf32>
    %cst_9 = arith.constant dense<0.000000e+00> : vector<16xf32>
    %15 = vector.multi_reduction <add>, %14, %cst_9 [1] : vector<16x32xf32> to vector<16xf32>
    %16 = vector.shape_cast %15 : vector<16xf32> to vector<16x1xf32>
    %cst_10 = arith.constant 3.200000e+01 : f32
    %17 = vector.broadcast %cst_10 : f32 to vector<16x1xf32>
    %18 = arith.divf %16, %17 : vector<16x1xf32>
    %cst_11 = arith.constant 9.99999996E-13 : f32
    %19 = vector.broadcast %cst_11 : f32 to vector<16x1xf32>
    %20 = arith.addf %18, %19 : vector<16x1xf32>
    %21 = math.rsqrt %20 : vector<16x1xf32>
    %22 = vector.broadcast %21 : vector<16x1xf32> to vector<16x32xf32>
    %23 = arith.mulf %13, %22 : vector<16x32xf32>
    %c0_12 = arith.constant 0 : index
    %c0_13 = arith.constant 0 : index
    %24 = vector.load %arg5[%c0_12, %c0_13] : memref<1x32xf32, #tpu.memory_space<vmem>>, vector<1x32xf32>
    %25 = vector.broadcast %24 : vector<1x32xf32> to vector<16x32xf32>
    %26 = arith.mulf %23, %25 : vector<16x32xf32>
    %c0_14 = arith.constant 0 : index
    %c0_15 = arith.constant 0 : index
    %27 = vector.load %arg6[%c0_14, %c0_15] : memref<1x32xf32, #tpu.memory_space<vmem>>, vector<1x32xf32>
    %28 = vector.broadcast %27 : vector<1x32xf32> to vector<16x32xf32>
    %29 = arith.addf %26, %28 : vector<16x32xf32>
    %c0_16 = arith.constant 0 : index
    %c0_17 = arith.constant 0 : index
    %30 = vector.load %arg7[%c0_16, %c0_17] : memref<16x32xf32, #tpu.memory_space<vmem>>, vector<16x32xf32>
    tpu.vector_store %arg7[%c0_16, %c0_17], %29 {strides = array<i32>} : memref<16x32xf32, #tpu.memory_space<vmem>>, vector<16x32xf32>,
    return
  }
  func.func @transform_0(%arg0: i32) -> (i32, i32) {
    %c0_i32 = arith.constant 0 : i32
    %c0_i32_0 = arith.constant 0 : i32
    return %arg0, %c0_i32 : i32, i32
  }
  func.func @transform_1(%arg0: i32) -> (i32, i32) {
    %c0_i32 = arith.constant 0 : i32
    %c0_i32_0 = arith.constant 0 : i32
    return %arg0, %c0_i32 : i32, i32
  }
  func.func @transform_2(%arg0: i32) -> (i32, i32) {
    %c0_i32 = arith.constant 0 : i32
    %c0_i32_0 = arith.constant 0 : i32
    %c0_i32_1 = arith.constant 0 : i32
    return %c0_i32, %c0_i32_0 : i32, i32
  }
  func.func @transform_3(%arg0: i32) -> (i32, i32) {
    %c0_i32 = arith.constant 0 : i32
    %c0_i32_0 = arith.constant 0 : i32
    %c0_i32_1 = arith.constant 0 : i32
    return %c0_i32, %c0_i32_0 : i32, i32
  }
  func.func @transform_4(%arg0: i32) -> (i32, i32) {
    %c0_i32 = arith.constant 0 : i32
    %c0_i32_0 = arith.constant 0 : i32
    %c0_i32_1 = arith.constant 0 : i32
    return %c0_i32, %c0_i32_0 : i32, i32
  }
  func.func @transform_5(%arg0: i32) -> (i32, i32) {
    %c0_i32 = arith.constant 0 : i32
    %c0_i32_0 = arith.constant 0 : i32
    %c0_i32_1 = arith.constant 0 : i32
    return %c0_i32, %c0_i32_0 : i32, i32
  }
  func.func @transform_6(%arg0: i32) -> (i32, i32) {
    %c0_i32 = arith.constant 0 : i32
    %c0_i32_0 = arith.constant 0 : i32
    return %arg0, %c0_i32 : i32, i32
  }
}

</mosaic_0001>

<bundles_post_ra>
// kernel: tpu_custom_call.1
= control target key start
LH: loop header
LB: loop body
LE: loop exit
PB: predicated region body
PF: predicated region fallthrough
CT: control target
= control target key end

     0   :  { %11 = vsyncpa [#allocation3], 0  ;;  %s420_s0 = inlined_call_operand.hbm [shape: bf16[16,32], index: 0, kind: input, shape index: {}]   ;;  %s421_s1 = inlined_call_operand.hbm [shape: f32[16,32], index: 1, kind: input, shape index: {}]   ;;  %s422_s2 = inlined_call_operand.hbm [shape: bf16[32,32], index: 2, kind: input, shape index: {}]   ;;  %s423_s3 = inlined_call_operand.vmem [shape: f32[1,32], index: 3, kind: input, shape index: {}]   ;;  %s424_s4 = inlined_call_operand.vmem [shape: f32[1,32], index: 4, kind: input, shape index: {}]   ;;  %s425_s5 = inlined_call_operand.vmem [shape: f32[1,32], index: 5, kind: input, shape index: {}]   ;;  %s426_s6 = inlined_call_operand.hbm [shape: f32[16,32], index: 6, kind: output, shape index: {}]  }
   0x1   :  { %12 = vsyncpa [#allocation6], 0  ;;  %s31_s23 = sshll.u32 %s421_s1, 4  ;;  %s32_s23 = int_to_ptr.hbm [resolvable:$true] %s31_s23 }
   0x2   :  { %13 = vsyncpa [#allocation4], 0  ;;  %s342_s24 = smov [#allocation5]   ;;  %s18_s28 = sshll.u32 %s420_s0, 4  ;;  %s19_s28 = int_to_ptr.hbm [resolvable:$true] %s18_s28 }
   0x3   :  { %s33_s25 = sshll.u32 %s342_s24, 4  ;;  %s343_s29 = smov 128   ;;  %s34_s25 = int_to_ptr.vmem [resolvable:$true] %s33_s25 }
   0x4   :  { %s344_s30 = smov 8   ;;  %s345_s7 = smov [#allocation2]  }
   0x5   :  { %39 = dma.hbm_to_vmem [thread:$0]  %s32_s23, 256, %s34_s25, [#allocation6], %s343_s29, %s343_s29, %s344_s30  }
   0x6   :  { %s20_s8 = sshll.u32 %s345_s7, 4  ;;  %s346_s1 = smov 64   ;;  %s21_s8 = int_to_ptr.vmem [resolvable:$true] %s20_s8 }
   0x7   :  { %s347_s9 = smov 4   ;;  %s44_s12 = sshll.u32 %s422_s2, 4  ;;  %s45_s12 = int_to_ptr.hbm [resolvable:$true] %s44_s12 }
   0x8   :  { %26 = dma.hbm_to_vmem [thread:$0]  %s19_s28, 128, %s21_s8, [#allocation3], %s346_s1, %s346_s1, %s347_s9  }
   0x9   :  { %s348_s13 = smov [#allocation7]  }
   0xa   :  { %s46_s0 = sshll.u32 %s348_s13, 4  ;;  %s47_s0 = int_to_ptr.vmem [resolvable:$true] %s46_s0 }
   0xb   :  { %52 = dma.hbm_to_vmem [thread:$0]  %s45_s12, 256, %s47_s0, [#allocation6], %s346_s1, %s346_s1, %s347_s9  }
   0xc   :  { %336 = dma.done.wait [#allocation3], 128  }
   0xd   :  { %337 = vsyncadd [#allocation3], 4294967168 }
   0xe   :  { %338 = dma.done.wait [#allocation6], 512  }
   0xf   :  { %339 = vsyncadd [#allocation6], 4294966784  ;;  %v221_v0 = vld [vmem:[#allocation7 + $0x8] sm:$0xff]  ;;  %v220_v1 = vld [vmem:[#allocation7] sm:$0xff]  ;;  %vm99_vm0 = vcmask 261120   ;;  %v349_v14 = vmov 32.0  }
  0x10   :  { %109 = vmatpush.bf16.msra.mxu0 %v221_v0  ;;  %v219_v2 = vld [vmem:[#allocation2] sm:$0xff]  ;;  %v117_v5 = vld [vmem:[#allocation5] sm:$0xff]  ;;  %v118_v10 = vld [vmem:[#allocation5 + $0x8] sm:$0xff]  ;;  %234 = vrcp.f32 %v349_v14  ;;  %s192_s21 = sshll.u32 %s426_s6, 4  ;;  %s193_s21 = int_to_ptr.hbm [resolvable:$true] %s192_s21 }
  0x11   :  { %v231_v3 = vld [vmem:[%s423_s3] ss:$0 sm:$0xff] }
  0x12   :  { %v232_v45 = vld [vmem:[%s424_s4] ss:$0 sm:$0xff]  ;;  %s350_s4 = smov [#allocation8]  }
  0x13   :  { %v233_v49 = vld [vmem:[%s425_s5] ss:$0 sm:$0xff]  ;;  %s190_s18 = sshll.u32 %s350_s4, 4  ;;  %s191_s18 = int_to_ptr.vmem [resolvable:$true] %s190_s18 }
  0x14   :  { %110 = vmatpush.bf16.msra.mxu0 %v220_v1 }
  0x16   :  { %v235_v15 = vpop.eup %234 }
  0x17   :  { %218 = vmatmul.msk.bf16.vlgmr.msra.gmra.mxu0 %vm99_vm0, %v219_v2  ;;  %v128_v16 = vmul.f32 32.0, %v235_v15  ;;  %vm132_vm1 = vweird.f32 %v235_v15 }
  0x19   :  { %v129_v17 = vsub.f32 1.0, %v128_v16 }
  0x1b   :  { %v130_v18 = vmul.f32 %v235_v15, %v129_v17 }
  0x1d   :  { %v131_v19 = vadd.f32 %v235_v15, %v130_v18 }
  0x1f   :  { %v133_v20 = vsel %vm132_vm1, %v235_v15, %v131_v19 }
  0x94   :  { %v112_v4 = vpop.f32.mrf.mxu0 }
  0x95   :  { %v113_v6 = vadd.f32 %v231_v3, %v112_v4 }
  0x97   :  { %v119_v7 = vadd.f32 %v117_v5, %v113_v6 }
  0x99   :  { %v121_v8 = vsel %vm99_vm0, %v119_v7, 0.0 }
  0x9a   :  { %122 = vadd.xlane.f32.xlu0 %v121_v8 }
  0x9c   :  { %v114_v9 = vpop.f32.mrf.mxu0 }
  0x9d   :  { %v115_v11 = vadd.f32 %v231_v3, %v114_v9 }
  0x9f   :  { %v120_v12 = vadd.f32 %v118_v10, %v115_v11 }
  0xa1   :  { %v124_v13 = vsel %vm99_vm0, %v120_v12, 0.0 }
  0xa2   :  { %125 = vadd.xlane.f32.xlu0 %v124_v13 }
 0x10d   :  { %v123_v21 = vpop.xlane.xlu0 %122 }
 0x10e   :  { %v134_v22 = vmul.f32 %v133_v20, %v123_v21 }
 0x110   :  { %v136_v23 = vsub.f32 %v119_v7, %v134_v22 }
 0x112   :  { %v138_v24 = vmul.f32 %v136_v23, %v136_v23 }
 0x114   :  { %v140_v25 = vsel %vm99_vm0, %v138_v24, 0.0 }
 0x115   :  { %141 = vadd.xlane.f32.xlu1 %v140_v25  ;;  %v126_v26 = vpop.xlane.xlu0 %125 }
 0x116   :  { %v135_v27 = vmul.f32 %v133_v20, %v126_v26 }
 0x118   :  { %v137_v28 = vsub.f32 %v120_v12, %v135_v27 }
 0x11a   :  { %v139_v29 = vmul.f32 %v137_v28, %v137_v28 }
 0x11c   :  { %v143_v30 = vsel %vm99_vm0, %v139_v29, 0.0 }
 0x11d   :  { %144 = vadd.xlane.f32.xlu1 %v143_v30 }
 0x188   :  { %v142_v31 = vpop.xlane.xlu1 %141 }
 0x189   :  { %v146_v32 = vmul.f32 %v142_v31, %v133_v20 }
 0x18b   :  { %v148_v33 = vadd.f32 1e-12, %v146_v32 }
 0x18d   :  { %236 = vrsqrt.f32 %v148_v33  ;;  %vm156_vm3 = vweird.f32 %v148_v33 }
 0x190   :  { %v145_v34 = vpop.xlane.xlu1 %144 }
 0x191   :  { %v147_v35 = vmul.f32 %v145_v34, %v133_v20 }
 0x193   :  { %v237_v36 = vpop.eup %236  ;;  %v149_v37 = vadd.f32 1e-12, %v147_v35 }
 0x194   :  { %v151_v38 = vmul.f32 %v237_v36, %v148_v33  ;;  %vm157_vm2 = vweird.f32 %v237_v36 }
 0x195   :  { %238 = vrsqrt.f32 %v149_v37  ;;  %vm158_vm4 = vmor %vm156_vm3, %vm157_vm2  ;;  %vm166_vm6 = vweird.f32 %v149_v37 }
 0x196   :  { %v152_v39 = vmul.f32 %v237_v36, %v151_v38 }
 0x198   :  { %v153_v40 = vmul.f32 0.5, %v152_v39 }
 0x19a   :  { %v154_v41 = vsub.f32 1.5, %v153_v40 }
 0x19b   :  { %v239_v42 = vpop.eup %238 }
 0x19c   :  { %v155_v43 = vmul.f32 %v237_v36, %v154_v41  ;;  %v161_v44 = vmul.f32 %v239_v42, %v149_v37  ;;  %vm167_vm5 = vweird.f32 %v239_v42 }
 0x19d   :  { %vm168_vm7 = vmor %vm166_vm6, %vm167_vm5 }
 0x19e   :  { %v159_v46 = vsel %vm158_vm4, %v237_v36, %v155_v43  ;;  %v162_v47 = vmul.f32 %v239_v42, %v161_v44 }
 0x19f   :  { %v170_v48 = vmul.f32 %v159_v46, %v136_v23 }
 0x1a0   :  { %v163_v50 = vmul.f32 0.5, %v162_v47 }
 0x1a1   :  { %v176_v51 = vmul.f32 %v232_v45, %v170_v48 }
 0x1a2   :  { %v164_v52 = vsub.f32 1.5, %v163_v50 }
 0x1a3   :  { %v182_v53 = vadd.f32 %v233_v49, %v176_v51 }
 0x1a4   :  { %v165_v54 = vmul.f32 %v239_v42, %v164_v52 }
 0x1a5   :  { %184 = vst.msk [vmem:[#allocation8] sm:$0xff] %vm99_vm0, %v182_v53 }
 0x1a6   :  { %v169_v55 = vsel %vm168_vm7, %v239_v42, %v165_v54 }
 0x1a7   :  { %v171_v56 = vmul.f32 %v169_v55, %v137_v28 }
 0x1a9   :  { %v177_v57 = vmul.f32 %v232_v45, %v171_v56 }
 0x1ab   :  { %v183_v58 = vadd.f32 %v233_v49, %v177_v57 }
 0x1ad   :  { %185 = vst.msk [vmem:[#allocation8 + $0x8] sm:$0xff] %vm99_vm0, %v183_v58 }
 0x1ae   :  { %198 = dma.vmem_to_hbm [thread:$0]  %s191_s18, 256, %s193_s21, [#allocation4], %s343_s29, %s343_s29, %s344_s30  }
 0x1af   :  { %340 = dma.done.wait [#allocation4], 256  }
 0x1b0   :  { %341 = vsyncadd [#allocation4], 4294967040 }
 0x1b1   :  { %203 = vsyncpa [#allocation3], 1 }
 0x1b2   :  { %204 = vsyncpa [#allocation6], 1 }
 0x1b3   :  { %205 = vsyncpa [#allocation4], 1 }

</bundles_post_ra>
